<compile_context>
chip_gen: v6e
topology: v6e:2x2x1
jax: 0.10.0
libtpu: 0.0.40
codegen_flags: <defaults>
</compile_context>

<pallas_src>
import jax
import jax.numpy as jnp
from jax.experimental import pallas as pl
from jax.experimental.pallas import tpu as pltpu


def _round_up(x, m):
    return ((x + m - 1) // m) * m


def _cdiv(a, b):
    return -(-a // b)


# ---------------------------------------------------------------------------
# Kernels
# ---------------------------------------------------------------------------

def _linear_kernel_single(x_ref, w_ref, b_ref, o_ref):
    """nk == 1: single dot + bias, written straight to the output block."""
    acc = jnp.dot(x_ref[...], w_ref[...], preferred_element_type=jnp.float32)
    o_ref[...] = (acc + b_ref[...].astype(jnp.float32)).astype(o_ref.dtype)


def _linear_kernel_multi_f32(x_ref, w_ref, b_ref, o_ref):
    """nk > 1, f32 output: accumulate directly into the VMEM-resident o_ref."""
    k = pl.program_id(2)

    @pl.when(k == 0)
    def _init():
        o_ref[...] = jnp.broadcast_to(
            b_ref[...].astype(o_ref.dtype), o_ref.shape)

    o_ref[...] += jnp.dot(x_ref[...], w_ref[...],
                          preferred_element_type=jnp.float32)


def _linear_kernel_multi_acc(x_ref, w_ref, b_ref, o_ref, acc_ref):
    """nk > 1, low-precision output: f32 scratch accumulator."""
    k = pl.program_id(2)

    @pl.when(k == 0)
    def _init():
        acc_ref[...] = jnp.broadcast_to(
            b_ref[...].astype(jnp.float32), acc_ref.shape)

    acc_ref[...] += jnp.dot(x_ref[...], w_ref[...],
                            preferred_element_type=jnp.float32)

    @pl.when(k == pl.num_programs(2) - 1)
    def _finalize():
        o_ref[...] = acc_ref[...].astype(o_ref.dtype)


# ---------------------------------------------------------------------------
# Tiling / wrapper
# ---------------------------------------------------------------------------

def _vmem_budget_and_limit():
    """Generation-aware VMEM working-set budget + scoped-VMEM limit."""
    cap = 64 << 20  # conservative default (v7x per-TensorCore VMEM)
    try:
        info = pltpu.get_tpu_info()
        cap = int(getattr(info, "vmem_capacity_bytes", cap)) or cap
    except Exception:
        pass
    limit = max(min(cap - (8 << 20), 100 << 20), 32 << 20)
    budget = max(min((cap * 3) // 4 - (8 << 20), 80 << 20), 16 << 20)
    return budget, limit


def _choose_tiles(M, F, H, itemsize, budget):
    """Pick (TILE_M, TILE_K, TILE_N, F_pad, H_pad)."""
    H_pad = _round_up(H, 128)
    F128 = _round_up(max(F, 1), 128)

    # N (output) tiling: keep whole padded H resident unless it is very wide.
    tile_n = H_pad if H_pad <= 2048 else 512   # 256-multiple fills v6e/v7x MXU

    # K tiling: prefer nk == 1 so the weights are streamed from HBM once.
    w_cap = max(budget // 3, 4 << 20)
    tile_k = F128
    k_floor = min(F128, 512)
    while tile_k > k_floor and 2 * tile_k * tile_n * itemsize > w_cap:
        tile_k -= 128
    nk = _cdiv(F128, tile_k)
    if nk == 1:
        tile_k, F_pad = F, F           # full-K block: no K padding of x / w
    else:
        tile_k = _round_up(_cdiv(F128, nk), 128)
        F_pad = nk * tile_k

    # M tiling: biggest tile whose working set fits the VMEM budget.
    tk_mem = F128 if nk == 1 else tile_k
    tile_m = 8
    for cand in (4096, 2048, 1024, 512, 256, 128, 64, 32, 16, 8):
        use = (2 * cand * (tk_mem + tile_n) * itemsize   # x + out (2 bufs)
               + 2 * tk_mem * tile_n * itemsize          # weights (2 bufs)
               + 2 * tile_n * itemsize                   # bias
               + (cand * tile_n * 4 if nk > 1 else 0))   # worst-case f32 acc
        if use <= budget:
            tile_m = cand
            break
    tile_m = min(tile_m, _round_up(max(M, 1), 8))
    # Keep >= 2 M-tiles for moderate/large M so both v7x TensorCores get work
    # (costs only ~0.35us of extra per-step overhead on single-TC chips).
    if M >= 512:
        tile_m = min(tile_m, _round_up(_cdiv(M, 2), 8))
    return tile_m, tile_k, tile_n, F_pad, H_pad


def _linear_pallas(x2d, w, b, *, force_tiles=None):
    """x2d: (M, F), w: (F, H), b: (H,) or (1, H) -> (M, H)."""
    M, F = x2d.shape
    H = w.shape[1]
    itemsize = x2d.dtype.itemsize
    budget, vmem_limit = _vmem_budget_and_limit()

    if force_tiles is None:
        tile_m, tile_k, tile_n, F_pad, H_pad = _choose_tiles(
            M, F, H, itemsize, budget)
    else:  # test hook: exercise the multi-K / multi-N paths at small shapes
        tile_m, tile_k, tile_n = force_tiles
        H_pad = _round_up(H, 128)
        nk = _cdiv(max(F, 1), tile_k)
        if nk == 1:
            tile_k, F_pad = F, F
        else:
            tile_k = _round_up(_cdiv(_round_up(F, 128), nk), 128)
            F_pad = nk * tile_k
        tile_m = min(tile_m, _round_up(max(M, 1), 8))

    nm = _cdiv(M, tile_m)
    nn = _cdiv(H_pad, tile_n)
    nk = _cdiv(F_pad, tile_k)

    # Zero-pad only where correctness needs it (K reduction, lane-dense H).
    xp = x2d if F_pad == F else jnp.pad(x2d, ((0, 0), (0, F_pad - F)))
    wp = w
    if (F_pad, H_pad) != (F, H):
        wp = jnp.pad(w, ((0, F_pad - F), (0, H_pad - H)))
    bp = b.reshape(1, H)
    if H_pad != H:
        bp = jnp.pad(bp, ((0, 0), (0, H_pad - H)))

    if nk == 1:
        kernel, scratch = _linear_kernel_single, ()
    elif x2d.dtype == jnp.float32:
        kernel, scratch = _linear_kernel_multi_f32, ()
    else:
        kernel = _linear_kernel_multi_acc
        scratch = (pltpu.VMEM((tile_m, tile_n), jnp.float32),)

    w_streams = 1 if (nn == 1 and nk == 1) else nm
    cost = pl.CostEstimate(
        flops=int(2 * M * max(F_pad, 1) * H_pad),
        transcendentals=0,
        bytes_accessed=int((nn * M * F_pad + w_streams * F_pad * H_pad
                            + nn * H_pad + M * H_pad) * itemsize),
    )

    out = pl.pallas_call(
        kernel,
        out_shape=jax.ShapeDtypeStruct((M, H_pad), x2d.dtype),
        grid_spec=pltpu.PrefetchScalarGridSpec(
            num_scalar_prefetch=0,
            grid=(nm, nn, nk),
            in_specs=[
                pl.BlockSpec((tile_m, tile_k), lambda i, j, k: (i, k)),
                pl.BlockSpec((tile_k, tile_n), lambda i, j, k: (k, j)),
                pl.BlockSpec((1, tile_n), lambda i, j, k: (0, j)),
            ],
            out_specs=pl.BlockSpec((tile_m, tile_n), lambda i, j, k: (i, j)),
            scratch_shapes=scratch,
        ),
        compiler_params=pltpu.CompilerParams(
            dimension_semantics=("parallel", "parallel", "arbitrary"),
            vmem_limit_bytes=int(vmem_limit),
        ),
        cost_estimate=cost,
    )(xp, wp, bp)

    return out if H_pad == H else out[:, :H]


def time_distributed_linear(x, w, b, batch_first=True, *, force_tiles=None):
    """TimeDistributed(Linear) forward.

    x: (..., F)   (typically (B, T, F))
    w: (F, H)     (transposed PyTorch Linear weight)
    b: (1, H) or (H,)
    """
    if x.ndim <= 2:
        x2d = x if x.ndim == 2 else x[None, :]
        out = _linear_pallas(x2d, w, b, force_tiles=force_tiles)
        return out if x.ndim == 2 else out[0]

    F = x.shape[-1]
    x_reshape = x.reshape(-1, F)                 # x.contiguous().view(-1, F)
    out = _linear_pallas(x_reshape, w, b, force_tiles=force_tiles)  # (B*T, H)
    H = out.shape[-1]
    if batch_first:
        return out.reshape(x.shape[0], -1, H)    # (B, T, H)
    return out.reshape(-1, x.shape[1], H)        # (T, B, H) view semantics


def make_linear_params(key, in_features, out_features, dtype=jnp.float32):
    """Deterministic init matching nn.Linear shapes: W (H, F), b (H,)."""
    kw, kb = jax.random.split(key)
    bound = 1.0 / jnp.sqrt(in_features)
    w_pt = jax.random.uniform(
        kw, (out_features, in_features), dtype, minval=-bound, maxval=bound)
    b_pt = jax.random.uniform(
        kb, (out_features,), dtype, minval=-bound, maxval=bound)
    # Pre-transpose for the kernel: (F, H); keep bias 2D for TPU layout.
    return w_pt.T, b_pt.reshape(1, out_features)


if __name__ == "__main__":
    key = jax.random.PRNGKey(0)
    kx, kp = jax.random.split(key)

    # 1) Tiny shape, single K tile, padded H (lane-dense out), f32.
    B, T, F, H = 2, 8, 32, 32
    x = jax.random.normal(kx, (B, T, F), dtype=jnp.float32)
    w, b = make_linear_params(kp, F, H)
    out = jax.block_until_ready(time_distributed_linear(x, w, b))
    ref = (x.reshape(-1, F) @ w + b).reshape(B, -1, H)
    assert out.shape == (B, T, H)
    assert jnp.allclose(out, ref, atol=1e-5, rtol=1e-5)

    # 2) Ragged M (B*T not a tile multiple), F/H not 128-multiples.
    B2, T2, F2, H2 = 3, 37, 96, 80
    x2 = jax.random.normal(kx, (B2, T2, F2), dtype=jnp.float32)
    w2, b2 = make_linear_params(kp, F2, H2)
    out2 = jax.block_until_ready(time_distributed_linear(x2, w2, b2))
    ref2 = (x2.reshape(-1, F2) @ w2 + b2).reshape(B2, -1, H2)
    assert out2.shape == (B2, T2, H2)
    assert jnp.allclose(out2, ref2, atol=1e-5, rtol=1e-5)

    # 3) Forced small tiles: exercises the multi-K (accumulate-into-o_ref)
    #    path, the N tiling axis and a ragged last M tile at small shapes.
    B3, T3, F3, H3 = 2, 40, 256, 256
    x3 = jax.random.normal(kx, (B3, T3, F3), dtype=jnp.float32)
    w3, b3 = make_linear_params(kp, F3, H3)
    out3 = jax.block_until_ready(
        time_distributed_linear(x3, w3, b3, force_tiles=(64, 128, 128)))
    ref3 = (x3.reshape(-1, F3) @ w3 + b3).reshape(B3, -1, H3)
    assert out3.shape == (B3, T3, H3)
    assert jnp.allclose(out3, ref3, atol=1e-3, rtol=1e-3)

    # 4) bf16 data path with multi-K: exercises the f32 scratch accumulator.
    x4 = x3.astype(jnp.bfloat16)
    w4, b4 = w3.astype(jnp.bfloat16), b3.astype(jnp.bfloat16)
    out4 = jax.block_until_ready(
        time_distributed_linear(x4, w4, b4, force_tiles=(64, 128, 128)))
    ref4 = (x4.astype(jnp.float32).reshape(-1, F3) @ w4.astype(jnp.float32)
            + b4.astype(jnp.float32)).reshape(B3, -1, H3)
    assert out4.shape == (B3, T3, H3)
    assert jnp.allclose(out4.astype(jnp.float32), ref4, atol=5e-2, rtol=5e-2)

    print("KERNEL_OK")
</pallas_src>

<mosaic_0001>
module attributes {stable_mosaic.version = 11 : i64} {
  func.func @_linear_kernel_single(%arg0: i32, %arg1: i32, %arg2: i32, %arg3: memref<16x32xf32, #tpu.memory_space<vmem>>, %arg4: memref<32x128xf32, #tpu.memory_space<vmem>>, %arg5: memref<1x128xf32, #tpu.memory_space<vmem>>, %arg6: memref<16x128xf32, #tpu.memory_space<vmem>>) attributes {dimension_semantics = [#tpu.dimension_semantics<parallel>, #tpu.dimension_semantics<parallel>, #tpu.dimension_semantics<arbitrary>], iteration_bounds = array<i64: 1, 1, 1>, scalar_prefetch = 0 : i64, scratch_operands = 0 : i64, tpu.core_type = #tpu.core_type<tc>, window_params = [{transform_indices = @transform_0, window_bounds = array<i64: 16, 32>}, {transform_indices = @transform_1, window_bounds = array<i64: 32, 128>}, {transform_indices = @transform_2, window_bounds = array<i64: 1, 128>}, {transform_indices = @transform_3, window_bounds = array<i64: 16, 128>}]} {
    %c0 = arith.constant 0 : index
    %c0_0 = arith.constant 0 : index
    %0 = vector.load %arg3[%c0, %c0_0] : memref<16x32xf32, #tpu.memory_space<vmem>>, vector<16x32xf32>
    %c0_1 = arith.constant 0 : index
    %c0_2 = arith.constant 0 : index
    %1 = vector.load %arg4[%c0_1, %c0_2] : memref<32x128xf32, #tpu.memory_space<vmem>>, vector<32x128xf32>
    %cst = arith.constant dense<0.000000e+00> : vector<16x128xf32>
    %2 = tpu.matmul %0, %1, %cst {dimension_numbers = #tpu.dot_dimension_numbers<[1], [0], [0], [1], [0, 0, 1, 1], [], []>} : vector<16x32xf32>, vector<32x128xf32>, vector<16x128xf32> -> vector<16x128xf32>
    %c0_3 = arith.constant 0 : index
    %c0_4 = arith.constant 0 : index
    %3 = vector.load %arg5[%c0_3, %c0_4] : memref<1x128xf32, #tpu.memory_space<vmem>>, vector<1x128xf32>
    %4 = vector.broadcast %3 : vector<1x128xf32> to vector<16x128xf32>
    %5 = arith.addf %2, %4 : vector<16x128xf32>
    %c0_5 = arith.constant 0 : index
    %c0_6 = arith.constant 0 : index
    %6 = vector.load %arg6[%c0_5, %c0_6] : memref<16x128xf32, #tpu.memory_space<vmem>>, vector<16x128xf32>
    tpu.vector_store %arg6[%c0_5, %c0_6], %5 {strides = array<i32>} : memref<16x128xf32, #tpu.memory_space<vmem>>, vector<16x128xf32>,
    return
  }
  func.func @transform_0(%arg0: i32, %arg1: i32, %arg2: i32) -> (i32, i32) {
    %c0_i32 = arith.constant 0 : i32
    return %arg0, %arg2 : i32, i32
  }
  func.func @transform_1(%arg0: i32, %arg1: i32, %arg2: i32) -> (i32, i32) {
    %c0_i32 = arith.constant 0 : i32
    return %arg2, %arg1 : i32, i32
  }
  func.func @transform_2(%arg0: i32, %arg1: i32, %arg2: i32) -> (i32, i32) {
    %c0_i32 = arith.constant 0 : i32
    %c0_i32_0 = arith.constant 0 : i32
    return %c0_i32, %arg1 : i32, i32
  }
  func.func @transform_3(%arg0: i32, %arg1: i32, %arg2: i32) -> (i32, i32) {
    %c0_i32 = arith.constant 0 : i32
    return %arg0, %arg1 : i32, i32
  }
}

</mosaic_0001>

<bundles_post_ra>
// kernel: tpu_custom_call.1
= control target key start
LH: loop header
LB: loop body
LE: loop exit
PB: predicated region body
PF: predicated region fallthrough
CT: control target
= control target key end

     0   :  { %8 = vsyncpa [#allocation3], 0  ;;  %s297_s0 = inlined_call_operand.hbm [shape: f32[16,32], index: 0, kind: input, shape index: {}]   ;;  %s298_s1 = inlined_call_operand.hbm [shape: f32[32,128], index: 1, kind: input, shape index: {}]   ;;  %s299_s2 = inlined_call_operand.vmem [shape: f32[1,128], index: 2, kind: input, shape index: {}]   ;;  %s300_s3 = inlined_call_operand.hbm [shape: f32[16,128], index: 3, kind: output, shape index: {}]  }
   0x1   :  { %9 = vsyncpa [#allocation6], 0 }
   0x2   :  { %10 = vsyncpa [#allocation4], 0  ;;  %s249_s12 = smov [#allocation2]  }
   0x3   :  { %s16_s13 = sshll.u32 %s249_s12, 4  ;;  %s17_s13 = int_to_ptr.vmem [resolvable:$true] %s16_s13 }
   0x4   :  { %s191_s14 = scalar_lea.vmem %s17_s13, 256  ;;  %p196_p1 = scmp.lt.s32.totalorder %s17_s13, %s17_s13 }
   0x5   :  { %p192_p0 = scmp.ne.s32.totalorder %s17_s13, %s191_s14  ;;  %p197_p2 = scmp.lt.s32.totalorder %s191_s14, %s191_s14 }
   0x7   :  { %p198_p3 = por %p197_p2, %p196_p1 }
   0x9   :  { %p199_p4 = pnand %p198_p3, %p192_p0 }
   0xb   :  { %202 = shalt.err (!%p199_p4)
}
   0xc   :  { %s250_s15 = smov 128   ;;  %s251_s16 = smov 8  }
   0xd   :  { %22 = dma.hbm_to_vmem [thread:$0]  %s297_s0, 256, %s17_s13, [#allocation3], %s250_s15, %s250_s15, %s251_s16  }
   0xe   :  { %s252_s19 = smov [#allocation5]  }
   0xf   :  { %s28_s20 = sshll.u32 %s252_s19, 4  ;;  %s29_s20 = int_to_ptr.vmem [resolvable:$true] %s28_s20 }
  0x10   :  { %s211_s21 = scalar_lea.vmem %s29_s20, 512  ;;  %p216_p6 = scmp.lt.s32.totalorder %s29_s20, %s29_s20 }
  0x11   :  { %p212_p5 = scmp.ne.s32.totalorder %s29_s20, %s211_s21  ;;  %p217_p7 = scmp.lt.s32.totalorder %s211_s21, %s211_s21 }
  0x13   :  { %p218_p8 = por %p217_p7, %p216_p6 }
  0x15   :  { %p219_p9 = pnand %p218_p8, %p212_p5 }
  0x17   :  { %222 = shalt.err (!%p219_p9)
}
  0x18   :  { %34 = dma.hbm_to_vmem [thread:$0]  %s298_s1, 512, %s29_s20, [#allocation6], %s250_s15, %s250_s15, %s251_s16  }
  0x19   :  { %243 = dma.done.wait [#allocation3], 256  }
  0x1a   :  { %244 = vsyncadd [#allocation3], 4294967040 }
  0x1b   :  { %245 = dma.done.wait [#allocation6], 512  }
  0x1c   :  { %246 = vsyncadd [#allocation6], 4294966784  ;;  %vm56_vm0 = vcmask 261120   ;;  %v48_v0 = vld [vmem:[#allocation5 + $0x18] sm:$0xff]  ;;  %v47_v1 = vld [vmem:[#allocation5 + $0x10] sm:$0xff]  ;;  %s253_s24 = smov [#allocation7]  }
  0x1d   :  { %167 = vmatprep.subr.mxu0 %v48_v0  ;;  %v43_v2 = vld [vmem:[#allocation2] sm:$0xff]  ;;  %v46_v3 = vld [vmem:[#allocation5 + $0x8] sm:$0xff]  ;;  %v45_v4 = vld [vmem:[#allocation5] sm:$0xff]  ;;  %s145_s25 = sshll.u32 %s253_s24, 4  ;;  %s146_s25 = int_to_ptr.vmem [resolvable:$true] %s145_s25 }
  0x1e   :  { %168 = vmatpush3.msra.mxu0 %v48_v0  ;;  %175 = vmatprep.mubr.msk.f32.mxu0 %vm56_vm0, %v43_v2  ;;  %v44_v5 = vld [vmem:[#allocation2 + $0x8] sm:$0xff]  ;;  %v158_v6 = vld [vmem:[%s299_s2] ss:$0 sm:$0xff]  ;;  %s223_s26 = scalar_lea.vmem %s146_s25, 256  ;;  %p228_p11 = scmp.lt.s32.totalorder %s146_s25, %s146_s25 }
  0x1f   :  { %169 = vmatprep.subr.mxu0 %v47_v1  ;;  %p224_p10 = scmp.ne.s32.totalorder %s146_s25, %s223_s26  ;;  %p229_p12 = scmp.lt.s32.totalorder %s223_s26, %s223_s26 }
  0x20   :  { %170 = vmatpush3.msra.mxu0 %v47_v1 }
  0x21   :  { %171 = vmatprep.subr.mxu0 %v46_v3  ;;  %p230_p13 = por %p229_p12, %p228_p11 }
  0x22   :  { %172 = vmatpush3.msra.mxu0 %v46_v3 }
  0x23   :  { %173 = vmatprep.subr.mxu0 %v45_v4  ;;  %p231_p0 = pnand %p230_p13, %p224_p10 }
  0x24   :  { %174 = vmatpush3.msra.mxu0 %v45_v4 }
  0x25   :  { %176 = vmatmul.mubr.msk.f32.vlgmr.msra.gmra.mxu0 %vm56_vm0, %v44_v5 }
  0xe5   :  { %v177_v7 = vpop.f32.mrf.mxu0 }
  0xe6   :  { %v135_v8 = vadd.f32 %v177_v7, %v158_v6 }
  0xe7   :  { %v129_v9 = vpop.f32.mrf.mxu0 }
  0xe8   :  { %139 = vst [vmem:[#allocation7 + $0x8] sm:$0xff] %v135_v8  ;;  %v130_v10 = vadd.f32 %v158_v6, %v129_v9 }
  0xea   :  { %138 = vst [vmem:[#allocation7] sm:$0xff] %v130_v10 }
  0xeb   :  { %234 = shalt.err (!%p231_p0)
}
  0xec   :  { %151 = dma.vmem_to_hbm [thread:$0]  %s146_s25, 256, %s300_s3, [#allocation4], %s250_s15, %s250_s15, %s251_s16  }
  0xed   :  { %247 = dma.done.wait [#allocation4], 256  }
  0xee   :  { %248 = vsyncadd [#allocation4], 4294967040 }
  0xef   :  { %155 = vsyncpa [#allocation3], 1 }
  0xf0   :  { %156 = vsyncpa [#allocation6], 1 }
  0xf1   :  { %157 = vsyncpa [#allocation4], 1 }

</bundles_post_ra>
